<compile_context>
chip_gen: v7x
topology: tpu7x:2x2x1
jax: 0.10.0
libtpu: 0.0.40
codegen_flags: <defaults>
</compile_context>

<pallas_src>
import functools

import jax
import jax.numpy as jnp
from jax import lax
from jax.experimental import pallas as pl
from jax.experimental.pallas import tpu as pltpu


def _dynamic_conv2d_kernel(xlhs_ref, wband_ref, pool_ref, w1_ref, b1_ref, w2_ref,
                           b2_ref, brep_ref, out_ref, *, n_basis, wp_lanes,
                           inv_temperature):
    """One grid step == one batch element.

    xlhs_ref : (1, H_out, k*Wp*C_in)               bf16  conv-GEMM LHS (k row-shifted windows)
    wband_ref: (k*Wp*C_in, n_basis*W_out*out)      bf16  W-banded aggregate conv weights
    pool_ref : (k*Wp*C_in, k*C_in)                 f32   freq-mean-pool + fc1 tap selector
    w1_ref   : (k*C_in, hidden)                    f32   fc1 Conv1d taps with BN scale folded
    b1_ref   : (1, hidden)                         f32   folded BN shift
    w2_ref   : (hidden, n_basis); b2_ref: (1, n_basis)
    brep_ref : (n_basis, W_out*out)                f32   per-basis conv bias replicated over W_out
    out_ref  : (H_out, W_out*out)                  f32   lane-dense output tile
    """
    xlhs = xlhs_ref[0]                                               # (H_out, k*Wp*C_in) bf16

    # ---------------- attention branch (pool_dim == 'freq'), f32 ----------------
    # mean over the original W columns + fc1 tap-window gather as one tiny GEMM
    p1 = jnp.dot(xlhs.astype(jnp.float32), pool_ref[...],
                 preferred_element_type=jnp.float32)                 # (H_out, k*C_in)
    h1 = jnp.maximum(jnp.dot(p1, w1_ref[...], preferred_element_type=jnp.float32)
                     + b1_ref[...], 0.0)                             # fc1 + folded BN + ReLU
    logits = (jnp.dot(h1, w2_ref[...], preferred_element_type=jnp.float32)
              + b2_ref[...]) * inv_temperature                       # (H_out, n_basis)
    logits = logits - jnp.max(logits, axis=-1, keepdims=True)
    e = jnp.exp(logits)
    attn = e * pl.reciprocal(jnp.sum(e, axis=-1, keepdims=True), approx=True)

    # ---------------- conv2d over ALL basis kernels: one bf16 MXU GEMM ----------------
    acc = jnp.dot(xlhs, wband_ref[...],
                  preferred_element_type=jnp.float32)                # (H_out, n_basis*W_out*out)

    # ---------------- attention-weighted combine over basis kernels ----------------
    # sum_k a_k*(conv_k + b_k) = sum_k a_k*conv_k + attn @ B   (bias added post-attention)
    out = jnp.dot(attn, brep_ref[...], preferred_element_type=jnp.float32)  # (H_out, W_out*out)
    for kb in range(n_basis):                        # 128-lane-aligned basis blocks
        out = out + attn[:, kb:kb + 1] * acc[:, kb * wp_lanes:(kb + 1) * wp_lanes]

    out_ref[...] = out.astype(out_ref.dtype)         # single unmasked, lane-dense store


def dynamic_conv2d_forward(x, weight, bias, fc1_w, bn_gamma, bn_beta, bn_mean, bn_var,
                           fc2_w, fc2_b, *, stride=1, padding=0, temperature=31.0,
                           bn_eps=1e-5):
    """Dynamic_conv2d forward, pool_dim='freq', inference-mode BatchNorm.

    x: (B, C_in, H, W); weight: (n_basis, out_planes, C_in, k, k); bias: (n_basis, out_planes)
    fc1_w: (hidden, C_in, k) (Conv1d, bias-free); BN params: (hidden,)
    fc2_w: (n_basis, hidden, 1); fc2_b: (n_basis,)
    Returns (B, out_planes, H_out, W_out).
    """
    B, C_in, H, W = x.shape
    n_basis, out_planes, _, k, _ = weight.shape
    hidden = fc1_w.shape[0]
    H_out = (H + 2 * padding - k) // stride + 1
    W_out = (W + 2 * padding - k) // stride + 1
    Hp, Wp = H + 2 * padding, W + 2 * padding
    KK = k * Wp * C_in                    # conv-GEMM contraction depth
    WPL = W_out * out_planes              # lane width of one basis block / of the output
    f32 = jnp.float32

    # --- layout plumbing (wrapper): NCHW -> NHWC, zero pad, k row-shifted H-tap windows ---
    xp = jnp.transpose(x.astype(f32), (0, 2, 3, 1))
    xp = jnp.pad(xp, ((0, 0), (padding, padding), (padding, padding), (0, 0)))
    taps = [xp[:, kh: kh + stride * (H_out - 1) + 1: stride, :, :] for kh in range(k)]
    xlhs = jnp.stack(taps, axis=2).reshape(B, H_out, KK).astype(jnp.bfloat16)

    # --- conv weights, W-banded: one GEMM directly yields the (h, kb*W_out*out) slab ---
    # wband[(kh, wa, c), (kb, w, o)] = weight[kb, o, c, kh, wa - w*stride]  (0 outside band)
    sel = (jnp.arange(Wp)[:, None, None]
           == jnp.arange(W_out)[None, :, None] * stride
           + jnp.arange(k)[None, None, :]).astype(f32)                 # (Wp, W_out, k)
    w_t = jnp.transpose(weight.astype(f32), (3, 4, 2, 0, 1))           # (kh, kw, c, kb, o)
    wband = jnp.einsum('awk,hkcbo->hacbwo', sel, w_t)                  # (kh, wa, c, kb, w, o)
    wband = wband.reshape(KK, n_basis * WPL).astype(jnp.bfloat16)

    # --- freq-mean-pool (+ fc1 tap selection):  p1 = xlhs @ pool ---
    col_ok = ((jnp.arange(Wp) >= padding) & (jnp.arange(Wp) < padding + W)).astype(f32) / W
    pool = jnp.einsum('ij,a,cd->iacjd', jnp.eye(k, dtype=f32), col_ok,
                      jnp.eye(C_in, dtype=f32)).reshape(KK, k * C_in)

    # --- fold inference BatchNorm into the bias-free fc1 Conv1d ---
    scale = (bn_gamma / jnp.sqrt(bn_var + bn_eps)).astype(f32)
    shift = (bn_beta - bn_mean * scale).astype(f32)
    w1 = (jnp.transpose(fc1_w.astype(f32), (2, 1, 0)) * scale[None, None, :]
          ).reshape(k * C_in, hidden)
    b1 = shift.reshape(1, hidden)
    w2 = jnp.transpose(fc2_w[:, :, 0].astype(f32), (1, 0))             # (hidden, n_basis)
    b2 = fc2_b.astype(f32).reshape(1, n_basis)
    brep = jnp.tile(bias.astype(f32), (1, W_out))                      # (n_basis, W_out*out)

    kernel = functools.partial(_dynamic_conv2d_kernel, n_basis=n_basis, wp_lanes=WPL,
                               inv_temperature=float(1.0 / temperature))

    cost = pl.CostEstimate(
        flops=int(2 * B * H_out * KK * (n_basis * WPL)       # dynamic conv GEMM
                  + 2 * B * H_out * KK * k * C_in            # pooling GEMM
                  + 2 * B * H_out * (k * C_in * hidden + hidden * n_basis + n_basis * WPL)
                  + 2 * B * H_out * n_basis * WPL),          # basis combine
        transcendentals=int(B * H_out * (n_basis + 1)),
        bytes_accessed=int(xlhs.size * 2 + wband.size * 2 + pool.size * 4
                           + (w1.size + b1.size + w2.size + b2.size + brep.size) * 4
                           + B * H_out * WPL * 4))

    out2 = pl.pallas_call(
        kernel,
        out_shape=jax.ShapeDtypeStruct((B * H_out, WPL), jnp.float32),
        grid=(B,),
        in_specs=[
            pl.BlockSpec((1, H_out, KK), lambda b: (b, 0, 0)),
            pl.BlockSpec((KK, n_basis * WPL), lambda b: (0, 0)),
            pl.BlockSpec((KK, k * C_in), lambda b: (0, 0)),
            pl.BlockSpec((k * C_in, hidden), lambda b: (0, 0)),
            pl.BlockSpec((1, hidden), lambda b: (0, 0)),
            pl.BlockSpec((hidden, n_basis), lambda b: (0, 0)),
            pl.BlockSpec((1, n_basis), lambda b: (0, 0)),
            pl.BlockSpec((n_basis, WPL), lambda b: (0, 0)),
        ],
        out_specs=pl.BlockSpec((H_out, WPL), lambda b: (b, 0)),
        compiler_params=pltpu.CompilerParams(
            dimension_semantics=("parallel",),
            vmem_limit_bytes=32 * 1024 * 1024),
        cost_estimate=cost,
    )(xlhs, wband, pool, w1, b1, w2, b2, brep)

    out = out2.reshape(B, H_out, W_out, out_planes)
    return jnp.transpose(out, (0, 3, 1, 2))                            # (B, out, H_out, W_out)


def dynamic_conv2d_reference(x, weight, bias, fc1_w, bn_gamma, bn_beta, bn_mean, bn_var,
                             fc2_w, fc2_b, *, stride, padding, temperature, bn_eps=1e-5):
    """Pure-JAX reference (lax.conv), PyTorch Dynamic_conv2d semantics, pool_dim='freq'."""
    B, C_in, H, W = x.shape
    n_basis, out_planes, _, k, _ = weight.shape
    hp = lax.Precision.HIGHEST

    # attention2d, pool_dim='freq'
    pooled = jnp.mean(x, axis=3)                                              # (B, C_in, H)
    y = lax.conv_general_dilated(pooled, fc1_w, (stride,), [(padding, padding)],
                                 dimension_numbers=('NCH', 'OIH', 'NCH'), precision=hp)
    scale = bn_gamma / jnp.sqrt(bn_var + bn_eps)
    y = y * scale[None, :, None] + (bn_beta - bn_mean * scale)[None, :, None]
    y = jnp.maximum(y, 0.0)
    z = lax.conv_general_dilated(y, fc2_w, (1,), [(0, 0)],
                                 dimension_numbers=('NCH', 'OIH', 'NCH'), precision=hp)
    z = z + fc2_b[None, :, None]
    attn = jax.nn.softmax(z / temperature, axis=1)                            # (B, n_basis, H_out)

    agg_w = weight.reshape(n_basis * out_planes, C_in, k, k)
    out = lax.conv_general_dilated(x, agg_w, (stride, stride),
                                   [(padding, padding), (padding, padding)],
                                   dimension_numbers=('NCHW', 'OIHW', 'NCHW'), precision=hp)
    out = out + bias.reshape(-1)[None, :, None, None]
    H_out, W_out = out.shape[2], out.shape[3]
    out = out.reshape(B, n_basis, out_planes, H_out, W_out)
    return jnp.sum(out * attn[:, :, None, :, None], axis=1)                   # (B, out, H_out, W_out)


if __name__ == "__main__":
    # Small shapes: batch=2, in_planes=4, spatial 16x16, out_planes=8, k=3, 4 basis kernels.
    B, C_in, H, W = 2, 4, 16, 16
    out_planes, k, stride, padding = 8, 3, 1, 1
    n_basis, temperature = 4, 31.0
    hidden = max(C_in // 4, 4)

    key = jax.random.PRNGKey(0)
    ks = jax.random.split(key, 8)
    x = jax.random.normal(ks[0], (B, C_in, H, W), jnp.float32)
    weight = 0.1 * jax.random.normal(ks[1], (n_basis, out_planes, C_in, k, k), jnp.float32)
    bias = 0.1 * jax.random.normal(ks[2], (n_basis, out_planes), jnp.float32)
    fc1_w = 0.2 * jax.random.normal(ks[3], (hidden, C_in, k), jnp.float32)
    fc2_w = 0.2 * jax.random.normal(ks[4], (n_basis, hidden, 1), jnp.float32)
    fc2_b = 0.1 * jax.random.normal(ks[5], (n_basis,), jnp.float32)
    bn_gamma = 1.0 + 0.1 * jax.random.normal(ks[6], (hidden,), jnp.float32)
    bn_beta = 0.1 * jax.random.normal(ks[7], (hidden,), jnp.float32)
    bn_mean = jnp.zeros((hidden,), jnp.float32)
    bn_var = jnp.ones((hidden,), jnp.float32)

    out = dynamic_conv2d_forward(x, weight, bias, fc1_w, bn_gamma, bn_beta, bn_mean, bn_var,
                                 fc2_w, fc2_b, stride=stride, padding=padding,
                                 temperature=temperature)
    out = jax.block_until_ready(out)

    ref = dynamic_conv2d_reference(x, weight, bias, fc1_w, bn_gamma, bn_beta, bn_mean, bn_var,
                                   fc2_w, fc2_b, stride=stride, padding=padding,
                                   temperature=temperature)
    ref = jax.block_until_ready(ref)

    assert out.shape == (B, out_planes, H, W), out.shape
    # bf16 MXU inputs -> tolerance loosened vs the pure-f32 path (per review guidance).
    max_err = float(jnp.max(jnp.abs(out - ref)))
    assert jnp.allclose(out, ref, atol=3e-2, rtol=3e-2), max_err

    print("KERNEL_OK")
</pallas_src>

<mosaic_0001>
module attributes {stable_mosaic.version = 11 : i64} {
  func.func @_dynamic_conv2d_kernel(%arg0: i32, %arg1: memref<1x16x216xbf16, #tpu.memory_space<vmem>>, %arg2: memref<216x512xbf16, #tpu.memory_space<vmem>>, %arg3: memref<216x12xf32, #tpu.memory_space<vmem>>, %arg4: memref<12x4xf32, #tpu.memory_space<vmem>>, %arg5: memref<1x4xf32, #tpu.memory_space<vmem>>, %arg6: memref<4x4xf32, #tpu.memory_space<vmem>>, %arg7: memref<1x4xf32, #tpu.memory_space<vmem>>, %arg8: memref<4x128xf32, #tpu.memory_space<vmem>>, %arg9: memref<16x128xf32, #tpu.memory_space<vmem>>) attributes {dimension_semantics = [#tpu.dimension_semantics<parallel>], iteration_bounds = array<i64: 2>, scalar_prefetch = 0 : i64, scratch_operands = 0 : i64, tpu.core_type = #tpu.core_type<tc>, window_params = [{transform_indices = @transform_0, window_bounds = array<i64: 1, 16, 216>}, {pipeline_mode = #tpu.pipeline_mode<synchronous>, transform_indices = @transform_1, window_bounds = array<i64: 216, 512>}, {pipeline_mode = #tpu.pipeline_mode<synchronous>, transform_indices = @transform_2, window_bounds = array<i64: 216, 12>}, {pipeline_mode = #tpu.pipeline_mode<synchronous>, transform_indices = @transform_3, window_bounds = array<i64: 12, 4>}, {pipeline_mode = #tpu.pipeline_mode<synchronous>, transform_indices = @transform_4, window_bounds = array<i64: 1, 4>}, {pipeline_mode = #tpu.pipeline_mode<synchronous>, transform_indices = @transform_5, window_bounds = array<i64: 4, 4>}, {pipeline_mode = #tpu.pipeline_mode<synchronous>, transform_indices = @transform_6, window_bounds = array<i64: 1, 4>}, {pipeline_mode = #tpu.pipeline_mode<synchronous>, transform_indices = @transform_7, window_bounds = array<i64: 4, 128>}, {transform_indices = @transform_8, window_bounds = array<i64: 16, 128>}]} {
    %c0 = arith.constant 0 : index
    %c0_0 = arith.constant 0 : index
    %c0_1 = arith.constant 0 : index
    %0 = vector.load %arg1[%c0, %c0_0, %c0_1] : memref<1x16x216xbf16, #tpu.memory_space<vmem>>, vector<1x16x216xbf16>
    %1 = vector.shape_cast %0 : vector<1x16x216xbf16> to vector<16x216xbf16>
    %2 = arith.extf %1 : vector<16x216xbf16> to vector<16x216xf32>
    %c0_2 = arith.constant 0 : index
    %c0_3 = arith.constant 0 : index
    %3 = vector.load %arg3[%c0_2, %c0_3] : memref<216x12xf32, #tpu.memory_space<vmem>>, vector<216x12xf32>
    %cst = arith.constant dense<0.000000e+00> : vector<16x12xf32>
    %4 = tpu.matmul %2, %3, %cst {dimension_numbers = #tpu.dot_dimension_numbers<[1], [0], [0], [1], [0, 0, 1, 1], [], []>} : vector<16x216xf32>, vector<216x12xf32>, vector<16x12xf32> -> vector<16x12xf32>
    %c0_4 = arith.constant 0 : index
    %c0_5 = arith.constant 0 : index
    %5 = vector.load %arg4[%c0_4, %c0_5] : memref<12x4xf32, #tpu.memory_space<vmem>>, vector<12x4xf32>
    %cst_6 = arith.constant dense<0.000000e+00> : vector<16x4xf32>
    %6 = tpu.matmul %4, %5, %cst_6 {dimension_numbers = #tpu.dot_dimension_numbers<[1], [0], [0], [1], [0, 0, 1, 1], [], []>} : vector<16x12xf32>, vector<12x4xf32>, vector<16x4xf32> -> vector<16x4xf32>
    %c0_7 = arith.constant 0 : index
    %c0_8 = arith.constant 0 : index
    %7 = vector.load %arg5[%c0_7, %c0_8] : memref<1x4xf32, #tpu.memory_space<vmem>>, vector<1x4xf32>
    %8 = vector.broadcast %7 : vector<1x4xf32> to vector<16x4xf32>
    %9 = arith.addf %6, %8 : vector<16x4xf32>
    %cst_9 = arith.constant 0.000000e+00 : f32
    %10 = vector.broadcast %cst_9 : f32 to vector<16x4xf32>
    %11 = arith.maximumf %9, %10 : vector<16x4xf32>
    %c0_10 = arith.constant 0 : index
    %c0_11 = arith.constant 0 : index
    %12 = vector.load %arg6[%c0_10, %c0_11] : memref<4x4xf32, #tpu.memory_space<vmem>>, vector<4x4xf32>
    %cst_12 = arith.constant dense<0.000000e+00> : vector<16x4xf32>
    %13 = tpu.matmul %11, %12, %cst_12 {dimension_numbers = #tpu.dot_dimension_numbers<[1], [0], [0], [1], [0, 0, 1, 1], [], []>} : vector<16x4xf32>, vector<4x4xf32>, vector<16x4xf32> -> vector<16x4xf32>
    %c0_13 = arith.constant 0 : index
    %c0_14 = arith.constant 0 : index
    %14 = vector.load %arg7[%c0_13, %c0_14] : memref<1x4xf32, #tpu.memory_space<vmem>>, vector<1x4xf32>
    %15 = vector.broadcast %14 : vector<1x4xf32> to vector<16x4xf32>
    %16 = arith.addf %13, %15 : vector<16x4xf32>
    %cst_15 = arith.constant 0.0322580636 : f32
    %17 = vector.broadcast %cst_15 : f32 to vector<16x4xf32>
    %18 = arith.mulf %16, %17 : vector<16x4xf32>
    %cst_16 = arith.constant dense<0xFF800000> : vector<16xf32>
    %19 = vector.multi_reduction <maximumf>, %18, %cst_16 [1] : vector<16x4xf32> to vector<16xf32>
    %20 = vector.shape_cast %19 : vector<16xf32> to vector<16x1xf32>
    %21 = vector.broadcast %20 : vector<16x1xf32> to vector<16x4xf32>
    %22 = arith.subf %18, %21 : vector<16x4xf32>
    %23 = math.exp %22 : vector<16x4xf32>
    %cst_17 = arith.constant dense<0.000000e+00> : vector<16xf32>
    %24 = vector.multi_reduction <add>, %23, %cst_17 [1] : vector<16x4xf32> to vector<16xf32>
    %25 = vector.shape_cast %24 : vector<16xf32> to vector<16x1xf32>
    %26 = tpu.reciprocal %25 {approx = true} : vector<16x1xf32> -> vector<16x1xf32>
    %27 = vector.broadcast %26 : vector<16x1xf32> to vector<16x4xf32>
    %28 = arith.mulf %23, %27 : vector<16x4xf32>
    %c0_18 = arith.constant 0 : index
    %c0_19 = arith.constant 0 : index
    %29 = vector.load %arg2[%c0_18, %c0_19] : memref<216x512xbf16, #tpu.memory_space<vmem>>, vector<216x512xbf16>
    %cst_20 = arith.constant dense<0.000000e+00> : vector<16x512xf32>
    %30 = tpu.matmul %1, %29, %cst_20 {dimension_numbers = #tpu.dot_dimension_numbers<[1], [0], [0], [1], [0, 0, 1, 1], [], []>} : vector<16x216xbf16>, vector<216x512xbf16>, vector<16x512xf32> -> vector<16x512xf32>
    %c0_21 = arith.constant 0 : index
    %c0_22 = arith.constant 0 : index
    %31 = vector.load %arg8[%c0_21, %c0_22] : memref<4x128xf32, #tpu.memory_space<vmem>>, vector<4x128xf32>
    %cst_23 = arith.constant dense<0.000000e+00> : vector<16x128xf32>
    %32 = tpu.matmul %28, %31, %cst_23 {dimension_numbers = #tpu.dot_dimension_numbers<[1], [0], [0], [1], [0, 0, 1, 1], [], []>} : vector<16x4xf32>, vector<4x128xf32>, vector<16x128xf32> -> vector<16x128xf32>
    %33 = vector.extract_strided_slice %28 {offsets = [0, 0], sizes = [16, 1], strides = [1, 1]} : vector<16x4xf32> to vector<16x1xf32>
    %34 = vector.extract_strided_slice %30 {offsets = [0, 0], sizes = [16, 128], strides = [1, 1]} : vector<16x512xf32> to vector<16x128xf32>
    %35 = vector.broadcast %33 : vector<16x1xf32> to vector<16x128xf32>
    %36 = arith.mulf %35, %34 : vector<16x128xf32>
    %37 = arith.addf %32, %36 : vector<16x128xf32>
    %38 = vector.extract_strided_slice %28 {offsets = [0, 1], sizes = [16, 1], strides = [1, 1]} : vector<16x4xf32> to vector<16x1xf32>
    %39 = vector.extract_strided_slice %30 {offsets = [0, 128], sizes = [16, 128], strides = [1, 1]} : vector<16x512xf32> to vector<16x128xf32>
    %40 = vector.broadcast %38 : vector<16x1xf32> to vector<16x128xf32>
    %41 = arith.mulf %40, %39 : vector<16x128xf32>
    %42 = arith.addf %37, %41 : vector<16x128xf32>
    %43 = vector.extract_strided_slice %28 {offsets = [0, 2], sizes = [16, 1], strides = [1, 1]} : vector<16x4xf32> to vector<16x1xf32>
    %44 = vector.extract_strided_slice %30 {offsets = [0, 256], sizes = [16, 128], strides = [1, 1]} : vector<16x512xf32> to vector<16x128xf32>
    %45 = vector.broadcast %43 : vector<16x1xf32> to vector<16x128xf32>
    %46 = arith.mulf %45, %44 : vector<16x128xf32>
    %47 = arith.addf %42, %46 : vector<16x128xf32>
    %48 = vector.extract_strided_slice %28 {offsets = [0, 3], sizes = [16, 1], strides = [1, 1]} : vector<16x4xf32> to vector<16x1xf32>
    %49 = vector.extract_strided_slice %30 {offsets = [0, 384], sizes = [16, 128], strides = [1, 1]} : vector<16x512xf32> to vector<16x128xf32>
    %50 = vector.broadcast %48 : vector<16x1xf32> to vector<16x128xf32>
    %51 = arith.mulf %50, %49 : vector<16x128xf32>
    %52 = arith.addf %47, %51 : vector<16x128xf32>
    %c0_24 = arith.constant 0 : index
    %c0_25 = arith.constant 0 : index
    %53 = vector.load %arg9[%c0_24, %c0_25] : memref<16x128xf32, #tpu.memory_space<vmem>>, vector<16x128xf32>
    tpu.vector_store %arg9[%c0_24, %c0_25], %52 {strides = array<i32>} : memref<16x128xf32, #tpu.memory_space<vmem>>, vector<16x128xf32>,
    return
  }
  func.func @transform_0(%arg0: i32) -> (i32, i32, i32) {
    %c0_i32 = arith.constant 0 : i32
    %c0_i32_0 = arith.constant 0 : i32
    %c0_i32_1 = arith.constant 0 : i32
    return %arg0, %c0_i32, %c0_i32_0 : i32, i32, i32
  }
  func.func @transform_1(%arg0: i32) -> (i32, i32) {
    %c0_i32 = arith.constant 0 : i32
    %c0_i32_0 = arith.constant 0 : i32
    %c0_i32_1 = arith.constant 0 : i32
    return %c0_i32, %c0_i32_0 : i32, i32
  }
  func.func @transform_2(%arg0: i32) -> (i32, i32) {
    %c0_i32 = arith.constant 0 : i32
    %c0_i32_0 = arith.constant 0 : i32
    %c0_i32_1 = arith.constant 0 : i32
    return %c0_i32, %c0_i32_0 : i32, i32
  }
  func.func @transform_3(%arg0: i32) -> (i32, i32) {
    %c0_i32 = arith.constant 0 : i32
    %c0_i32_0 = arith.constant 0 : i32
    %c0_i32_1 = arith.constant 0 : i32
    return %c0_i32, %c0_i32_0 : i32, i32
  }
  func.func @transform_4(%arg0: i32) -> (i32, i32) {
    %c0_i32 = arith.constant 0 : i32
    %c0_i32_0 = arith.constant 0 : i32
    %c0_i32_1 = arith.constant 0 : i32
    return %c0_i32, %c0_i32_0 : i32, i32
  }
  func.func @transform_5(%arg0: i32) -> (i32, i32) {
    %c0_i32 = arith.constant 0 : i32
    %c0_i32_0 = arith.constant 0 : i32
    %c0_i32_1 = arith.constant 0 : i32
    return %c0_i32, %c0_i32_0 : i32, i32
  }
  func.func @transform_6(%arg0: i32) -> (i32, i32) {
    %c0_i32 = arith.constant 0 : i32
    %c0_i32_0 = arith.constant 0 : i32
    %c0_i32_1 = arith.constant 0 : i32
    return %c0_i32, %c0_i32_0 : i32, i32
  }
  func.func @transform_7(%arg0: i32) -> (i32, i32) {
    %c0_i32 = arith.constant 0 : i32
    %c0_i32_0 = arith.constant 0 : i32
    %c0_i32_1 = arith.constant 0 : i32
    return %c0_i32, %c0_i32_0 : i32, i32
  }
  func.func @transform_8(%arg0: i32) -> (i32, i32) {
    %c0_i32 = arith.constant 0 : i32
    %c0_i32_0 = arith.constant 0 : i32
    return %arg0, %c0_i32 : i32, i32
  }
}

</mosaic_0001>

<bundles_post_ra>
// kernel: tpu_custom_call.1
= control target key start
LH: loop header
LB: loop body
LE: loop exit
PB: predicated region body
PF: predicated region fallthrough
CT: control target
= control target key end

     0   :  { %13 = vsyncpa [#allocation3], 0  ;;  %s2082_s0 = inlined_call_operand.vmem [shape: bf16[2,16,216], index: 0, kind: input, shape index: {}]   ;;  %s2083_s1 = inlined_call_operand.hbm [shape: bf16[216,512], index: 1, kind: input, shape index: {}]   ;;  %s2084_s2 = inlined_call_operand.vmem [shape: f32[216,12], index: 2, kind: input, shape index: {}]   ;;  %s2085_s3 = inlined_call_operand.vmem [shape: f32[12,4], index: 3, kind: input, shape index: {}]   ;;  %s2086_s4 = inlined_call_operand.vmem [shape: f32[1,4], index: 4, kind: input, shape index: {}]   ;;  %s2087_s5 = inlined_call_operand.vmem [shape: f32[4,4], index: 5, kind: input, shape index: {}]   ;;  %s2088_s6 = inlined_call_operand.vmem [shape: f32[1,4], index: 6, kind: input, shape index: {}]   ;;  %s2089_s7 = inlined_call_operand.vmem [shape: f32[4,128], index: 7, kind: input, shape index: {}]   ;;  %s2090_s8 = inlined_call_operand.hbm [shape: f32[32,128], index: 8, kind: output, shape index: {}]  }
   0x1   :  { %14 = vsyncpa [#allocation4], 0 }
   0x2   :  { %16 = vsyncpa [#allocation4 + $0x1], 0  ;;  %s1783_s27 = smov 0   ;;  %s1785_s28 = smov 0  }
   0x3   :  { %s1787_s29 = smov 0   ;;  %s1789_s30 = smov 0  }
   0x4 LB: > { %s1804_s9 = sadd.s32 4294967295, %s1723_s30   ;;  %s1305_s10 = sadd.s32 4294967294, %s1723_s30   ;;  %s1723_s30 = sphi %s1789_s30, %s2106_s30   ;;  %s1719_s29 = sphi %s1787_s29, %s2105_s29   ;;  %s1715_s28 = sphi %s1785_s28, %s2104_s28   ;;  %s1711_s27 = sphi %s1783_s27, %s2103_s27  }
   0x5   : > { %s1808_s11 = sadd.s32 1, %s1723_s30   ;;  %s202_s12 = sadd.s32 1, %s1719_s29 }
   0x6   : > { %s199_s13 = ssub.s32 %s1723_s30, %s1808_s11  ;;  %p212_p0 = scmp.ne.s32.totalorder %s1719_s29, %s1715_s28 }
   0x7   : > { %p200_p1 = scmp.eq.s32.totalorder %s199_s13, 0  ;;  %p213_p2 = scmp.eq.s32.totalorder %s1804_s9, 1 }
   0x8   : > { %p218_p3 = scmp.ne.s32.totalorder %s1715_s28, %s1711_s27  ;;  %p219_p4 = scmp.eq.s32.totalorder %s1305_s10, 1 }
   0x9   : > { %s1819_s14 = scalar_select %p200_p1, %s1719_s29, %s202_s12  }
   0xa   : > { %p1821_p5 = por %p213_p2, %p212_p0  ;;  %p1825_p6 = por %p219_p4, %p218_p3 }
   0xb   : > { %p1306_p7 = scmp.ge.s32.totalorder %s1723_s30, 1  ;;  %p226_p8 = scmp.lt.s32.totalorder %s1723_s30, 3 }
   0xc   : > { %s2094_s15 = scalar_select %p1821_p5, 1, 0 }
   0xd   : > { %s2095_s16 = scalar_select %p1825_p6, 1, 0 }
   0xe   : > { %p2091_p9 = scmp.eq.s32.totalorder %s1804_s9, 0  ;;  %p1832_p10 = pnand %p1306_p7, %p226_p8 }
   0xf   : > { %s1725_s18 = smov [#allocation2]   ;;  %s1629_s23 = scalar_lea.hbm %s2083_s1, 6912 }
  0x10   : > { %s2096_s17 = scalar_select %p1832_p10, 1, 0 }
  0x11   : > { %s238_s19 = sshll.u32 %s1725_s18, 4  ;;  %p1474_p11 = pneg %p1832_p10  ;;  %s239_s19 = int_to_ptr.vmem [resolvable:$true] %s238_s19 }
  0x12   : > { %p1630_p13 = scmp.ne.s32.totalorder %s2083_s1, %s1629_s23  ;;  %p1636_p3 = scmp.lt.u32.totalorder %s1629_s23, %s2083_s1 }
  0x13   : > { %p1840_p12 = pnand %p2091_p9, %p1474_p11 }
  0x15   : > { %p1631_p0 = pneg %p1840_p12 }
  0x17   : > { %p1632_p1 = pnand %p1631_p0, %p1630_p13 }
  0x19   : > { %p1633_p2 = pneg %p1632_p1 }
  0x1b   : > { %p1638_p4 = pnand %p1636_p3, %p1633_p2 }
  0x1d   : > { %1641 = shalt.err (!%p1638_p4)
}
  0x1e   : > { %s1642_s12 = scalar_lea.vmem %s239_s19, 6912  ;;  %p1650_p9 = scmp.lt.s32.totalorder %s239_s19, %s239_s19 }
  0x1f   : > { %p1643_p7 = scmp.ne.s32.totalorder %s239_s19, %s1642_s12  ;;  %p1651_p6 = scmp.lt.s32.totalorder %s1642_s12, %s1642_s12 }
  0x21   : > { %p1645_p8 = pnand %p1643_p7, %p1631_p0  ;;  %p1652_p5 = por %p1651_p6, %p1650_p9 }
  0x23   : > { %p1646_p11 = pneg %p1645_p8 }
  0x25   : > { %p1653_p10 = pnand %p1652_p5, %p1646_p11 }
  0x27   : > { %1656 = shalt.err (!%p1653_p10)
}
  0x28   : > { %s1726_s13 = smov 256   ;;  %s1727_s18 = smov 16  }
  0x29   : > { %1477 = dma.hbm_to_vmem [thread:$0]  (!%p1840_p12), %s2083_s1, 6912, %s239_s19, [#allocation3], %s1726_s13, %s1726_s13, %s1727_s18  }
  0x2a   : > { %p2098_p13 = scmp.ne.s32.totalorder %s2096_s17, 0 }
  0x2b   : > { %p2099_p1 = scmp.eq.s32.totalorder (!%p2098_p13), %s1804_s9, 0 }
  0x2c   : > { %280 = sbr.rel (%p2098_p13) target bundleno = 1313 (0x521), region = 52 }
  0x33   : > { %1702 = dma.done.wait (%p2099_p1), [#allocation3], 6912   ;;  %p2100_p0 = pmov %p2099_p1 }
  0x34   : > { %v1728_v0 = vmov 0.0|0.0   ;;  %p314_p5 = scmp.lt.s32.totalorder %s1804_s9, 1  ;;  %v327_v1 = vld [vmem:[%s2084_s2] sm:$0xff]  ;;  %v328_v2 = vld [vmem:[%s2084_s2 + $0x8] sm:$0xff]  ;;  %v329_v3 = vld [vmem:[%s2084_s2 + $0x10] sm:$0xff]  ;;  %vm354_vm0 = vcmask 719872  }
  0x35   : > { %1704 = vsyncadd (%p2100_p0), [#allocation3], 4294960384  ;;  %1423 = vmatprep.subr.bf16.mxu0 %v1728_v0  ;;  %v1424_v4 = vpack.c.bf16 %v328_v2, %v327_v1  ;;  %v330_v5 = vld [vmem:[%s2084_s2 + $0x18] sm:$0xff]  ;;  %v331_v7 = vld [vmem:[%s2084_s2 + $0x20] sm:$0xff]  ;;  %v1729_v43 = vmov 0.0   ;;  %vm452_vm1 = vcmask 1043456  }
  0x36   : > { %s315_s20 = scalar_select %p314_p5, %s1804_s9, 1  ;;  %v1427_v6 = vpack.c.bf16 %v330_v5, %v329_v3  ;;  %v332_v8 = vld [vmem:[%s2084_s2 + $0x28] sm:$0xff]  ;;  %v333_v10 = vld [vmem:[%s2084_s2 + $0x30] sm:$0xff]  ;;  %v334_v11 = vld [vmem:[%s2084_s2 + $0x38] sm:$0xff]  ;;  %vm1730_vm2 = vmmov 1   ;;  %vm445_vm4 = vcmask 97280  }
  0x37   : > { %1425 = vmatpush1.bf16.msra.mxu0 %v1424_v4  ;;  %v1430_v9 = vpack.c.bf16 %v332_v8, %v331_v7  ;;  %v335_v13 = vld [vmem:[%s2084_s2 + $0x40] sm:$0xff]  ;;  %v336_v14 = vld [vmem:[%s2084_s2 + $0x48] sm:$0xff]  ;;  %v1433_v16 = vpack.c.bf16 %v334_v11, %v333_v10  ;;  %v337_v17 = vld [vmem:[%s2084_s2 + $0x50] sm:$0xff]  ;;  %vm541_vm5 = vcmask 31744   ;;  %s311_s18 = sand.u32 1, %s1715_s28   ;;  %s1395_s22 = sshll.u32 %s1804_s9, 8 }
  0x38   : > { %s1394_s13 = sshll.u32 %s315_s20, 4  ;;  %1426 = vmatprep.subr.bf16.mxu0 %v1728_v0  ;;  %v338_v18 = vld [vmem:[%s2084_s2 + $0x58] sm:$0xff]  ;;  %v1436_v19 = vpack.c.bf16 %v336_v14, %v335_v13  ;;  %v339_v20 = vld [vmem:[%s2084_s2 + $0x60] sm:$0xff]  ;;  %v340_v21 = vld [vmem:[%s2084_s2 + $0x68] sm:$0xff]  ;;  %s2035_s19 = scalar_lea.hbm %s2090_s8, %s1395_s22 }
  0x39   : > { %s1891_s17 = scalar_lea.vmem %s2082_s0, %s1394_s13  ;;  %v1439_v22 = vpack.c.bf16 %v338_v18, %v337_v17  ;;  %v341_v23 = vld [vmem:[%s2084_s2 + $0x70] sm:$0xff]  ;;  %v342_v24 = vld [vmem:[%s2084_s2 + $0x78] sm:$0xff]  ;;  %v1442_v25 = vpack.c.bf16 %v340_v21, %v339_v20  ;;  %v343_v27 = vld [vmem:[%s2084_s2 + $0x80] sm:$0xff]  ;;  %s2041_s9 = scalar_lea.sflag [#allocation4], %s311_s18 }
  0x3a   : > { %v1901_v12 = vld [vmem:[%s1891_s17] sm:$0xff]  ;;  %v1445_v26 = vpack.c.bf16 %v342_v24, %v341_v23  ;;  %v344_v28 = vld [vmem:[%s2084_s2 + $0x88] sm:$0xff]  ;;  %v345_v30 = vld [vmem:[%s2084_s2 + $0x90] sm:$0xff]  ;;  %p2101_p9 = scmp.ne.s32.totalorder %s2094_s15, 0  ;;  %s1735_s25 = smov [#allocation5]  }
  0x3b   : > { %1428 = vmatpush1.bf16.msra.mxu0 %v1427_v6  ;;  %v324_v15 = vunpack.c.h.bf16 %v1901_v12  ;;  %v1448_v29 = vpack.c.bf16 %v344_v28, %v343_v27  ;;  %v346_v31 = vld [vmem:[%s2084_s2 + $0x98] sm:$0xff]  ;;  %v347_v33 = vld [vmem:[%s2084_s2 + $0xa0] sm:$0xff]  ;;  %v348_v34 = vld [vmem:[%s2084_s2 + $0xa8] sm:$0xff]  ;;  %v323_v45 = vunpack.c.l.bf16 %v1901_v12  ;;  %s1661_s26 = sshll.u32 %s1735_s25, 4  ;;  %s1662_s26 = int_to_ptr.vmem [resolvable:$false] %s1661_s26 }
  0x3c   : > { %1429 = vmatprep.subr.bf16.mxu0 %v1728_v0  ;;  %v1451_v32 = vpack.c.bf16 %v346_v31, %v345_v30  ;;  %v1454_v35 = vpack.c.bf16 %v348_v34, %v347_v33  ;;  %v349_v36 = vld [vmem:[%s2084_s2 + $0xb0] sm:$0xff]  ;;  %v350_v37 = vld [vmem:[%s2084_s2 + $0xb8] sm:$0xff]  ;;  %v351_v39 = vld [vmem:[%s2084_s2 + $0xc0] sm:$0xff]  ;;  %s1663_s10 = scalar_lea.vmem %s1662_s26, 512 }
  0x3d   : > { %1314 = vmatprep.mubr.msk.f32.mxu0 %vm354_vm0, %v324_v15  ;;  %v1457_v38 = vpack.c.bf16 %v350_v37, %v349_v36  ;;  %v352_v40 = vld [vmem:[%s2084_s2 + $0xc8] sm:$0xff]  ;;  %v353_v44 = vld [vmem:[%s2084_s2 + $0xd0] sm:$0xff]  ;;  %v436_v48 = vld [vmem:[%s2085_s3] sm:$0xff] }
  0x3e   : > { %v1460_v41 = vpack.c.bf16 %v352_v40, %v351_v39  ;;  %v1970_v42 = vld [vmem:[%s1891_s17 + $0x8] sm:$0xff]  ;;  %vm1463_vm3 = vmpackc.low %vm452_vm1, %vm1730_vm2  ;;  %v533_v55 = vld [vmem:[%s2087_s5] sm:$0xf]  ;;  %s1311_s17 = sshll.u32 %s311_s18, 4 }
  0x3f   : > { %1431 = vmatpush1.bf16.msra.mxu0 %v1430_v9  ;;  %v326_v46 = vunpack.c.h.bf16 %v1970_v42  ;;  %v325_v47 = vunpack.c.l.bf16 %v1970_v42  ;;  %v437_v49 = vld [vmem:[%s2085_s3 + $0x8] sm:$0xf]  ;;  %v1316_v56 = vld [vmem:[%s2086_s4] ss:$0 sm:$0xff]  ;;  %v1539_v9 = vld [vmem:[#allocation2 + $0x4] ss:$16 sps:$4 sm:$0xff]   ;;  %v1325_v10 = vcombine.high %v1901_v12, %v1970_v42 }
  0x40   : > { %1432 = vmatprep.subr.bf16.mxu0 %v1728_v0  ;;  %v1462_v50 = vpack.c.bf16 %v437_v49, %v436_v48  ;;  %v1320_v63 = vld [vmem:[%s2088_s6] ss:$0 sm:$0xff]  ;;  %v1542_v11 = vld [vmem:[#allocation2 + $0x24] ss:$16 sps:$4 sm:$0xff]   ;;  %v1549_v13 = vld [vmem:[#allocation2 + $0x8] ss:$16 sps:$4 sm:$0xff]  }
  0x41   : > { %v1537_v8 = vld [vmem:[#allocation2] ss:$16 sps:$4 sm:$0xff]   ;;  %v1551_v15 = vld [vmem:[#allocation2 + $0xc] ss:$16 sps:$4 sm:$0xff]   ;;  %v1555_v18 = vld [vmem:[#allocation2 + $0x28] ss:$16 sps:$4 sm:$0xff]  }
  0x42   : > { %1464 = vmatprep.subr.msk.bf16.mxu1 %vm1463_vm3, %v1462_v50  ;;  %v1540_v14 = vld [vmem:[#allocation2 + $0x20] ss:$16 sps:$4 sm:$0xff]   ;;  %v1557_v17 = vld [vmem:[#allocation2 + $0x2c] ss:$16 sps:$4 sm:$0xff]   ;;  %v1548_v21 = vld [vmem:[#allocation2 + $0x64] ss:$16 sps:$4 sm:$0xff]  }
  0x43   : > { %1434 = vmatpush1.bf16.msra.mxu0 %v1433_v16  ;;  %1467 = vmatpush3.bf16.msk.msra.mxu1 %vm1463_vm3, %v1462_v50  ;;  %v1545_v16 = vld [vmem:[#allocation2 + $0x44] ss:$16 sps:$4 sm:$0xff]   ;;  %v1563_v20 = vld [vmem:[#allocation2 + $0x4c] ss:$16 sps:$4 sm:$0xff]   ;;  %v1546_v23 = vld [vmem:[#allocation2 + $0x60] ss:$16 sps:$4 sm:$0xff]  }
  0x44   : > { %1435 = vmatprep.subr.bf16.mxu0 %v1728_v0  ;;  %1413 = vmatprep.subr.msk.mxu1 %vm452_vm1, %v533_v55  ;;  %v1569_v24 = vld [vmem:[#allocation2 + $0x6c] ss:$16 sps:$4 sm:$0xff]   ;;  %v1552_v27 = vld [vmem:[#allocation2 + $0x80] ss:$16 sps:$4 sm:$0xff]   ;;  %v1573_v30 = vld [vmem:[#allocation2 + $0x88] ss:$16 sps:$4 sm:$0xff]  }
  0x45   : > { %v1575_v28 = vld [vmem:[#allocation2 + $0x8c] ss:$16 sps:$4 sm:$0xff]   ;;  %v1558_v31 = vld [vmem:[#allocation2 + $0xa0] ss:$16 sps:$4 sm:$0xff]   ;;  %v1566_v33 = vld [vmem:[#allocation2 + $0xc4] ss:$16 sps:$4 sm:$0xff]  }
  0x46   : > { %v1579_v34 = vld [vmem:[#allocation2 + $0xa8] ss:$16 sps:$4 sm:$0xff]   ;;  %v1587_v36 = vld [vmem:[#allocation2 + $0xcc] ss:$16 sps:$4 sm:$0xff]   ;;  %v1572_v37 = vld [vmem:[#allocation2 + $0xe4] ss:$16 sps:$4 sm:$0xff]  }
  0x47   : > { %1437 = vmatpush1.bf16.msra.mxu0 %v1436_v19  ;;  %v1543_v19 = vld [vmem:[#allocation2 + $0x40] ss:$16 sps:$4 sm:$0xff]   ;;  %v1593_v40 = vld [vmem:[#allocation2 + $0xec] ss:$16 sps:$4 sm:$0xff]   ;;  %v1590_v50 = vld [vmem:[#allocation2 + $0x144] ss:$16 sps:$4 sm:$0xff]  }
  0x48   : > { %1438 = vmatprep.subr.bf16.mxu0 %v1728_v0  ;;  %v1570_v39 = vld [vmem:[#allocation2 + $0xe0] ss:$16 sps:$4 sm:$0xff]   ;;  %v1605_v49 = vld [vmem:[#allocation2 + $0x12c] ss:$16 sps:$4 sm:$0xff]   ;;  %s313_s13 = scalar_lea.vmem [#allocation5], %s1311_s17 }
  0x49   : > { %v1582_v48 = vld [vmem:[#allocation2 + $0x120] ss:$16 sps:$4 sm:$0xff]   ;;  %s1231_s21 = sshll.u32 %s313_s13, 4  ;;  %s2037_s21 = int_to_ptr.vmem [resolvable:$true] %s1231_s21 }
  0x4a   : > { %s1657_s20 = scalar_lea.vmem %s2037_s21, 256  ;;  %p1664_p2 = scmp.lt.s32.totalorder %s2037_s21, %s1662_s26 }
  0x4b   : > { %1440 = vmatpush1.bf16.msra.mxu0 %v1439_v22  ;;  %v1561_v22 = vld [vmem:[#allocation2 + $0x48] ss:$16 sps:$4 sm:$0xff]   ;;  %p1658_p6 = scmp.ne.s32.totalorder %s2037_s21, %s1657_s20  ;;  %p1665_p3 = scmp.lt.s32.totalorder %s1663_s10, %s1657_s20 }
  0x4c   : > { %1441 = vmatprep.subr.bf16.mxu0 %v1728_v0 }
  0x4d   : > { %p1659_p10 = pnand %p1658_p6, %p2101_p9  ;;  %p1666_p4 = por %p1665_p3, %p1664_p2 }
  0x4f   : > { %1443 = vmatpush1.bf16.msra.mxu0 %v1442_v25  ;;  %v1554_v25 = vld [vmem:[#allocation2 + $0x84] ss:$16 sps:$4 sm:$0xff]   ;;  %p1660_p12 = pneg %p1659_p10 }
  0x50   : > { %1444 = vmatprep.subr.bf16.mxu0 %v1728_v0 }
  0x51   : > { %p1667_p7 = pnand %p1666_p4, %p1660_p12 }
  0x53   : > { %1446 = vmatpush1.bf16.msra.mxu0 %v1445_v26  ;;  %v1567_v26 = vld [vmem:[#allocation2 + $0x68] ss:$16 sps:$4 sm:$0xff]  }
  0x54   : > { %1447 = vmatprep.subr.bf16.mxu0 %v1728_v0 }
  0x57   : > { %1449 = vmatpush1.bf16.msra.mxu0 %v1448_v29  ;;  %v1560_v29 = vld [vmem:[#allocation2 + $0xa4] ss:$16 sps:$4 sm:$0xff]  }
  0x58   : > { %1450 = vmatprep.subr.bf16.mxu0 %v1728_v0 }
  0x5b   : > { %1452 = vmatpush1.bf16.msra.mxu0 %v1451_v32  ;;  %v1581_v32 = vld [vmem:[#allocation2 + $0xac] ss:$16 sps:$4 sm:$0xff]  }
  0x5c   : > { %1453 = vmatprep.subr.bf16.mxu0 %v1728_v0 }
  0x5f   : > { %1455 = vmatpush1.bf16.msra.mxu0 %v1454_v35  ;;  %v1564_v35 = vld [vmem:[#allocation2 + $0xc0] ss:$16 sps:$4 sm:$0xff]  }
  0x60   : > { %1456 = vmatprep.subr.bf16.mxu0 %v1728_v0 }
  0x63   : > { %1458 = vmatpush1.bf16.msra.mxu0 %v1457_v38  ;;  %v1585_v38 = vld [vmem:[#allocation2 + $0xc8] ss:$16 sps:$4 sm:$0xff]  }
  0x64   : > { %1459 = vmatprep.subr.bf16.mxu0 %v1728_v0 }
  0x67   : > { %1461 = vmatpush1.bf16.msra.mxu0 %v1460_v41  ;;  %v1578_v41 = vld [vmem:[#allocation2 + $0x104] ss:$16 sps:$4 sm:$0xff]  }
  0x68   : > { %413 = vmatprep.subr.mxu0 %v1729_v43  ;;  %v1591_v43 = vld [vmem:[#allocation2 + $0xe8] ss:$16 sps:$4 sm:$0xff]  }
  0x6b   : > { %414 = vmatpush1.msra.mxu0 %v353_v44  ;;  %v1576_v44 = vld [vmem:[#allocation2 + $0x100] ss:$16 sps:$4 sm:$0xff]  }
  0x6c   : > { %426 = vmatmul.mubr.f32.vlgmr.msra.gmra.mrb[0].mxu0 %v323_v45  ;;  %1041 = vmatprep.subr.bf16.mxu0 %v1551_v15  ;;  %v1599_v45 = vld [vmem:[#allocation2 + $0x10c] ss:$16 sps:$4 sm:$0xff]  }
  0x6d   : > { %1315 = vmatprep.mubr.msk.f32.mxu0 %vm354_vm0, %v326_v46  ;;  %1042 = vmatpush1.bf16.msra.mxu0 %v1549_v13  ;;  %v1584_v46 = vld [vmem:[#allocation2 + $0x124] ss:$16 sps:$4 sm:$0xff]  }
  0x6e   : > { %1043 = vmatprep.subr.bf16.mxu0 %v1557_v17 }
  0x70   : > { %431 = vmatmul.mubr.f32.gmra.mrb[2].mxu0 %v325_v47  ;;  %v1597_v47 = vld [vmem:[#allocation2 + $0x108] ss:$16 sps:$4 sm:$0xff]  }
  0x71   : > { %1385 = vmatprep.mubr.msk.bf16.mxu0 %vm354_vm0, %v1325_v10  ;;  %1044 = vmatpush1.bf16.msra.mxu0 %v1555_v18 }
  0x72   : > { %1045 = vmatprep.subr.bf16.mxu0 %v1563_v20 }
  0x75   : > { %1046 = vmatpush1.bf16.msra.mxu0 %v1561_v22 }
  0x76   : > { %1047 = vmatprep.subr.bf16.mxu0 %v1569_v24 }
  0x79   : > { %1048 = vmatpush1.bf16.msra.mxu0 %v1567_v26 }
  0x7a   : > { %1049 = vmatprep.subr.bf16.mxu0 %v1575_v28 }
  0x7d   : > { %1050 = vmatpush1.bf16.msra.mxu0 %v1573_v30  ;;  %v1733_v30 = vmov 1  }
  0x7e   : > { %1051 = vmatprep.subr.bf16.mxu0 %v1581_v32 }
  0x81   : > { %1052 = vmatpush1.bf16.msra.mxu0 %v1579_v34 }
  0x82   : > { %1053 = vmatprep.subr.bf16.mxu0 %v1587_v36 }
  0x85   : > { %1054 = vmatpush1.bf16.msra.mxu0 %v1585_v38 }
  0x86   : > { %1055 = vmatprep.subr.bf16.mxu0 %v1593_v40 }
  0x89   : > { %1056 = vmatpush1.bf16.msra.mxu0 %v1591_v43 }
  0x8a   : > { %1057 = vmatprep.subr.bf16.mxu0 %v1599_v45 }
  0x8d   : > { %1058 = vmatpush1.bf16.msra.mxu0 %v1597_v47 }
  0x8e   : > { %1059 = vmatprep.subr.bf16.mxu0 %v1605_v49 }
 0x13f   : > { %v427_v51 = vpop.f32.mrb[0].mxu0 }
 0x140   : > { %v429_v52 = vpop.f32.mrb[1].mxu0  ;;  %1410 = vmatprep.mubr.msk.f32.mxu1 %vm445_vm4, %v427_v51  ;;  %v1603_v51 = vld [vmem:[#allocation2 + $0x128] ss:$16 sps:$4 sm:$0xff]  }
 0x141   : > { %v1588_v52 = vld [vmem:[#allocation2 + $0x140] ss:$16 sps:$4 sm:$0xff]   ;;  %1060 = vmatpush1.bf16.msra.mxu0 %v1603_v51 }
 0x143   : > { %v432_v53 = vpop.f32.mrb[2].mxu0 }
 0x144   : > { %v434_v54 = vpop.f32.mrb[3].mxu0  ;;  %1411 = vmatmul.mubr.msk.f32.vlgmr.msra.gmra.mrb[0].mxu1 %vm445_vm4, %v432_v53  ;;  %v1609_v53 = vld [vmem:[#allocation2 + $0x14c] ss:$16 sps:$4 sm:$0xff]  }
 0x145   : > { %1414 = vmatpush3.msk.msra.mxu1 %vm452_vm1, %v533_v55  ;;  %v1596_v54 = vld [vmem:[#allocation2 + $0x164] ss:$16 sps:$4 sm:$0xff]   ;;  %v1607_v55 = vld [vmem:[#allocation2 + $0x148] ss:$16 sps:$4 sm:$0xff]   ;;  %1061 = vmatprep.subr.bf16.mxu0 %v1609_v53 }
 0x146   : > { %998 = vmatprep.subr.bf16.mxu1 %v1539_v9  ;;  %1062 = vmatpush1.bf16.msra.mxu0 %v1607_v55 }
 0x217   : > { %v1412_v57 = vpop.f32.mrb[0].mxu1 }
 0x218   : > { %v528_v58 = vadd.f32 %v1412_v57, %v1316_v56  ;;  %v522_v59 = vpop.f32.mrb[1].mxu1  ;;  %v1615_v57 = vld [vmem:[#allocation2 + $0x16c] ss:$16 sps:$4 sm:$0xff]  }
 0x219   : > { %v523_v60 = vadd.f32 %v1316_v56, %v522_v59  ;;  %v1594_v56 = vld [vmem:[#allocation2 + $0x160] ss:$16 sps:$4 sm:$0xff]   ;;  %1063 = vmatprep.subr.bf16.mxu0 %v1615_v57 }
 0x21a   : > { %v532_v62 = vmax.f32 %v528_v58, 0.0  ;;  %v1602_v58 = vld [vmem:[#allocation2 + $0x184] ss:$16 sps:$4 sm:$0xff]  }
 0x21b   : > { %v531_v61 = vmax.f32 %v523_v60, 0.0  ;;  %v702_v59 = vld [vmem:[#allocation2 + $0x1a0] sm:$0xff]  ;;  %v1613_v60 = vld [vmem:[#allocation2 + $0x168] ss:$16 sps:$4 sm:$0xff]  }
 0x21c   : > { %1064 = vmatpush1.bf16.msra.mxu0 %v1613_v60 }
 0x21d   : > { %1415 = vmatprep.mubr.msk.f32.mxu1 %vm541_vm5, %v531_v61  ;;  %v1600_v61 = vld [vmem:[#allocation2 + $0x180] ss:$16 sps:$4 sm:$0xff]  }
 0x21e   : > { %1416 = vmatmul.mubr.msk.f32.vlgmr.msra.gmra.mrb[2].mxu1 %vm541_vm5, %v532_v62  ;;  %v1618_v62 = vld [vmem:[#allocation2 + $0x18c] ss:$16 sps:$4 sm:$0xff]  }
 0x21f   : > { %1383 = vmatprep.mubr.msk.bf16.mxu1 %vm354_vm0, %v1325_v10  ;;  %999 = vmatpush1.bf16.msra.mxu1 %v1537_v8  ;;  %v1324_v8 = vcombine.low %v1901_v12, %v1970_v42 }
 0x220   : > { %1000 = vmatprep.subr.bf16.mxu1 %v1542_v11  ;;  %1065 = vmatprep.subr.bf16.mxu0 %v1618_v62 }
 0x223   : > { %1001 = vmatpush1.bf16.msra.mxu1 %v1540_v14 }
 0x224   : > { %1002 = vmatprep.subr.bf16.mxu1 %v1545_v16 }
 0x227   : > { %1003 = vmatpush1.bf16.msra.mxu1 %v1543_v19  ;;  %v1731_v19 = vmov 0  }
 0x228   : > { %1004 = vmatprep.subr.bf16.mxu1 %v1548_v21  ;;  %1529 = vset.pattern.permute.xlu0 %v1731_v19 }
 0x229   : > { %1530 = vset.pattern.permute.xlu1 %v1731_v19 }
 0x22b   : > { %1005 = vmatpush1.bf16.msra.mxu1 %v1546_v23 }
 0x22c   : > { %1006 = vmatprep.subr.bf16.mxu1 %v1554_v25 }
 0x22f   : > { %1007 = vmatpush1.bf16.msra.mxu1 %v1552_v27 }
 0x230   : > { %1008 = vmatprep.subr.bf16.mxu1 %v1560_v29  ;;  %v1732_v29 = vmov 3  }
 0x233   : > { %1009 = vmatpush1.bf16.msra.mxu1 %v1558_v31 }
 0x234   : > { %1010 = vmatprep.subr.bf16.mxu1 %v1566_v33  ;;  %v1734_v33 = vmov 2  }
 0x237   : > { %1011 = vmatpush1.bf16.msra.mxu1 %v1564_v35 }
 0x238   : > { %1012 = vmatprep.subr.bf16.mxu1 %v1572_v37 }
 0x23b   : > { %1013 = vmatpush1.bf16.msra.mxu1 %v1570_v39 }
 0x23c   : > { %1014 = vmatprep.subr.bf16.mxu1 %v1578_v41 }
 0x23f   : > { %1015 = vmatpush1.bf16.msra.mxu1 %v1576_v44 }
 0x240   : > { %1016 = vmatprep.subr.bf16.mxu1 %v1584_v46 }
 0x243   : > { %1017 = vmatpush1.bf16.msra.mxu1 %v1582_v48 }
 0x244   : > { %1018 = vmatprep.subr.bf16.mxu1 %v1590_v50 }
 0x247   : > { %1019 = vmatpush1.bf16.msra.mxu1 %v1588_v52 }
 0x248   : > { %1020 = vmatprep.subr.bf16.mxu1 %v1596_v54 }
 0x24b   : > { %1021 = vmatpush1.bf16.msra.mxu1 %v1594_v56 }
 0x24c   : > { %1022 = vmatprep.subr.bf16.mxu1 %v1602_v58 }
 0x24f   : > { %1023 = vmatpush1.bf16.msra.mxu1 %v1600_v61 }
 0x2f1   : > { %v1417_v0 = vpop.f32.mrb[2].mxu1 }
 0x2f2   : > { %v617_v1 = vpop.f32.mrb[3].mxu1  ;;  %v623_v2 = vadd.f32 %v1417_v0, %v1320_v63  ;;  %v1378_v0 = vcombine.low %v702_v59, %v702_v59 }
 0x2f3   : > { %v618_v3 = vadd.f32 %v1320_v63, %v617_v1  ;;  %v1379_v63 = vcombine.high %v702_v59, %v702_v59  ;;  %v703_v1 = vld [vmem:[#allocation2 + $0x1a8] sm:$0xff] }
 0x2f4   : > { %v2001_v5 = vmul.f32 0.032258064, %v623_v2  ;;  %v1616_v2 = vld [vmem:[#allocation2 + $0x188] ss:$16 sps:$4 sm:$0xff]  }
 0x2f5   : > { %v1999_v4 = vmul.f32 0.032258064, %v618_v3  ;;  %v1381_v3 = vcombine.high %v703_v1, %v703_v1  ;;  %1382 = vmatprep.subr.msk.bf16.mxu1 %vm452_vm1, %v1379_v63  ;;  %1066 = vmatpush1.bf16.msra.mxu0 %v1616_v2 }
 0x2f6   : > { %v631_v7 = vsel %vm541_vm5, %v2001_v5, -inf }
 0x2f7   : > { %v628_v6 = vsel %vm541_vm5, %v1999_v4, -inf  ;;  %1384 = vmatprep.subr.msk.bf16.mxu0 %vm452_vm1, %v1381_v3 }
 0x2f8   : > { %629 = vmax.xlane.f32.xlu0 %v628_v6  ;;  %v1380_v6 = vcombine.low %v703_v1, %v703_v1 }
 0x2fa   : > { %v993_v9 = vsel %vm452_vm1, %v1380_v6, 0 }
 0x2fb   : > { %1068 = vmatpush1.bf16.msra.mxu0 %v993_v9 }
 0x2fc   : > { %632 = vmax.xlane.f32.xlu0 %v631_v7  ;;  %v987_v7 = vsel %vm452_vm1, %v1378_v0, 0 }
 0x2fd   : > { %1025 = vmatpush1.bf16.msra.mxu1 %v987_v7 }
 0x2fe   : > { %1074 = vmatmul.mubr.bf16.vlgmr.msra.gmra.mrb[4].mxu0 %v1324_v8 }
 0x300   : > { %1031 = vmatmul.mubr.bf16.vlgmr.msra.gmra.mrb[4].mxu1 %v1324_v8 }
 0x385   : > { %v630_v10 = vpop.xlane.xlu0 %629 }
 0x386   : > { %v634_v11 = vsub.f32 %v1999_v4, %v630_v10  ;;  %v1084_v4 = vld [vmem:[%s2089_s7] sm:$0xf] }
 0x387   : > { %1418 = vmatprep.subr.msk.mxu1 %vm452_vm1, %v1084_v4 }
 0x388   : > { %v636_v13 = vmul.f32 1.442695, %v634_v11  ;;  %1419 = vmatpush3.msk.msra.mxu1 %vm452_vm1, %v1084_v4 }
 0x389   : > { %v633_v14 = vpop.xlane.xlu0 %632 }
 0x38a   : > { %1621 = vpow2.f32 %v636_v13  ;;  %v635_v15 = vsub.f32 %v2001_v5, %v633_v14 }
 0x38c   : > { %v638_v16 = vmul.f32 1.442695, %v635_v15 }
 0x38e   : > { %1623 = vpow2.f32 %v638_v16 }
 0x394   : > { %v1622_v12 = vpop.eup %1621 }
 0x395   : > { %v640_v42 = vsel %vm541_vm5, %v1622_v12, 0.0 }
 0x396   : > { %641 = vadd.xlane.f32.xlu1 %v640_v42 }
 0x398   : > { %v1624_v17 = vpop.eup %1623 }
 0x399   : > { %v643_v18 = vsel %vm541_vm5, %v1624_v17, 0.0 }
 0x39a   : > { %644 = vadd.xlane.f32.xlu1 %v643_v18 }
 0x3d1   : > { %v1075_v31 = vpop.f32.mrb[4].mxu0 }
 0x3d2   : > { %v1077_v32 = vpop.f32.mrb[5].mxu0 }
 0x3d3   : > { %v1032_v21 = vpop.f32.mrb[4].mxu1  ;;  %v1079_v34 = vpop.f32.mrb[6].mxu0 }
 0x3d4   : > { %v1034_v24 = vpop.f32.mrb[5].mxu1  ;;  %v1081_v35 = vpop.f32.mrb[7].mxu0 }
 0x3d5   : > { %v1036_v26 = vpop.f32.mrb[6].mxu1 }
 0x3d6   : > { %v1038_v28 = vpop.f32.mrb[7].mxu1 }
 0x423   : > { %v642_v5 = vpop.xlane.xlu1 %641 }
 0x424   : > { %1625 = vrcp.f32 %v642_v5 }
 0x427   : > { %v645_v20 = vpop.xlane.xlu1 %644 }
 0x428   : > { %1627 = vrcp.f32 %v645_v20 }
 0x42e   : > { %v1626_v22 = vpop.eup %1625 }
 0x42f   : > { %v648_v23 = vmul.f32 %v1626_v22, %v1622_v12 }
 0x431   : > { %1087 = vperm.xlu0 %1529, %v648_v23   ;;  %1420 = vmatprep.mubr.msk.f32.mxu1 %vm541_vm5, %v648_v23 }
 0x432   : > { %v1628_v25 = vpop.eup %1627 }
 0x433   : > { %v649_v27 = vmul.f32 %v1628_v25, %v1624_v17 }
 0x435   : > { %1092 = vperm.xlu1 %1530, %v649_v27   ;;  %1421 = vmatmul.mubr.msk.f32.vlgmr.msra.gmra.mrb[8].mxu1 %vm541_vm5, %v649_v27 }
 0x436   : > { %1536 = vset.pattern.permute.xlu0 %v1732_v29 }
 0x439   : > { %1531 = vset.pattern.permute.xlu1 %v1733_v30 }
 0x43a   : > { %1184 = vperm.xlu1 %1531, %v649_v27  }
 0x43e   : > { %1532 = vset.pattern.permute.xlu1 %v1734_v33 }
 0x43f   : > { %1196 = vperm.xlu1 %1532, %v649_v27  }
 0x443   : > { %1533 = vset.pattern.permute.xlu1 %v1733_v30 }
 0x444   : > { %1180 = vperm.xlu1 %1533, %v648_v23  }
 0x448   : > { %1534 = vset.pattern.permute.xlu1 %v1734_v33 }
 0x449   : > { %1192 = vperm.xlu1 %1534, %v648_v23  }
 0x44d   : > { %1535 = vset.pattern.permute.xlu1 %v1732_v29 }
 0x44e   : > { %1204 = vperm.xlu1 %1535, %v648_v23  }
 0x452   : > { %1208 = vperm.xlu1 %1535, %v649_v27  }
 0x4b0   : > { %v1088_v43 = vpop.permute.xlu0 %1087 }
 0x4b1   : > { %v1095_v45 = vmul.f32 %v1088_v43, %v1032_v21 }
 0x4b4   : > { %v1093_v36 = vpop.permute.xlu1 %1092 }
 0x4b5   : > { %v1096_v44 = vmul.f32 %v1093_v36, %v1036_v26 }
 0x4b9   : > { %v1185_v37 = vpop.permute.xlu1 %1184 }
 0x4ba   : > { %v1188_v47 = vmul.f32 %v1185_v37, %v1038_v28 }
 0x4be   : > { %v1197_v38 = vpop.permute.xlu1 %1196 }
 0x4bf   : > { %v1200_v53 = vmul.f32 %v1197_v38, %v1079_v34 }
 0x4c3   : > { %v1181_v39 = vpop.permute.xlu1 %1180 }
 0x4c4   : > { %v1187_v50 = vmul.f32 %v1181_v39, %v1034_v24 }
 0x4c8   : > { %v1193_v40 = vpop.permute.xlu1 %1192 }
 0x4c9   : > { %v1199_v55 = vmul.f32 %v1193_v40, %v1075_v31 }
 0x4cd   : > { %v1205_v41 = vpop.permute.xlu1 %1204 }
 0x4ce   : > { %v1211_v59 = vmul.f32 %v1205_v41, %v1077_v32 }
 0x4d1   : > { %v1209_v51 = vpop.permute.xlu1 %1208 }
 0x4d2   : > { %v1212_v57 = vmul.f32 %v1209_v51, %v1081_v35 }
 0x508   : > { %v1422_v46 = vpop.f32.mrb[8].mxu1 }
 0x509   : > { %v1176_v48 = vadd.f32 %v1422_v46, %v1096_v44  ;;  %v1170_v49 = vpop.f32.mrb[9].mxu1 }
 0x50a   : > { %v1171_v52 = vadd.f32 %v1170_v49, %v1095_v45 }
 0x50b   : > { %v1190_v54 = vadd.f32 %v1188_v47, %v1176_v48 }
 0x50c   : > { %v1189_v56 = vadd.f32 %v1187_v50, %v1171_v52 }
 0x50d   : > { %v1202_v58 = vadd.f32 %v1200_v53, %v1190_v54 }
 0x50e   : > { %v1201_v60 = vadd.f32 %v1199_v55, %v1189_v56 }
 0x50f   : > { %v1214_v61 = vadd.f32 %v1212_v57, %v1202_v58 }
 0x510   : > { %v1213_v62 = vadd.f32 %v1211_v59, %v1201_v60 }
 0x511   : > { %1216 = vst [vmem:[%s313_s13 + $0x8] sm:$0xff] %v1214_v61 }
 0x512   : > { %1215 = vst [vmem:[%s313_s13] sm:$0xff] %v1213_v62 }
 0x513   : > { %1670 = shalt.err (!%p1667_p7)
}
 0x514   : > { %s1671_s12 = scalar_lea.hbm %s2035_s19, 256  ;;  %s1675_s13 = scalar_lea.hbm %s2090_s8, 512 }
 0x515   : > { %p1672_p8 = scmp.ne.s32.totalorder %s2035_s19, %s1671_s12  ;;  %p1676_p1 = scmp.lt.u32.totalorder %s2035_s19, %s2090_s8 }
 0x516   : > { %p1677_p0 = scmp.lt.u32.totalorder %s1675_s13, %s1671_s12  ;;  %p1679_p6 = scmp.lt.u32.totalorder %s1671_s12, %s2035_s19 }
 0x517   : > { %p1673_p11 = pnand %p1672_p8, %p2101_p9 }
 0x518   : > { %p1678_p5 = por %p1677_p0, %p1676_p1 }
 0x519   : > { %p1674_p13 = pneg %p1673_p11 }
 0x51a   : > { %p1680_p10 = por %p1679_p6, %p1678_p5 }
 0x51c   : > { %p1681_p12 = pnand %p1680_p10, %p1674_p13 }
 0x51e   : > { %1684 = shalt.err (!%p1681_p12)
}
 0x51f   : > { %s1736_s24 = smov 128   ;;  %s1737_s20 = smov 8  }
 0x520   : > { %1472 = dma.vmem_to_hbm [thread:$0]  (%p2101_p9), %s2037_s21, 256, %s2035_s19, %s2041_s9, %s1736_s24, %s1736_s24, %s1737_s20  }
 0x521 PF: > { %p1484_p2 = scmp.ge.s32.totalorder %s1723_s30, 2  ;;  %s1246_s25 = sand.u32 1, %s1711_s27  }
 0x522   : > { %p2102_p3 = scmp.ne.s32.totalorder %s2095_s16, 0  ;;  %s1247_s26 = scalar_lea.sflag [#allocation4], %s1246_s25 }
 0x524   : > { %p1479_p4 = pnand %p1484_p2, %p2102_p3 }
 0x526   : > { %1706 = dma.done.wait (!%p1479_p4), %s1247_s26, 256  }
 0x527   : > { %1708 = vsyncadd (!%p1479_p4), %s1247_s26, 4294967040  ;;  %p19_p7 = scmp.ge.s32.totalorder %s1808_s11, 4   ;;  %s2103_s27 = smov %s1715_s28 }
 0x528   : > { %s2104_s28 = smov %s1719_s29  ;;  %s2105_s29 = smov %s1819_s14 }
 0x529   : > { %s2106_s30 = smov %s1808_s11  ;;  %21 = sbr.rel (!%p19_p7) target bundleno = 4 (0x4), region = 92 }
 0x530   :  { %1252 = vsyncpa [#allocation3], 1 }
 0x531   :  { %1254 = vsyncpa [#allocation3 + $0x1], 1 }
 0x532   :  { %1255 = vsyncpa [#allocation4], 1 }
 0x533   :  { %1257 = vsyncpa [#allocation4 + $0x1], 1 }

</bundles_post_ra>
